<compile_context>
chip_gen: v5e
topology: v5e:2x2
jax: 0.10.0
libtpu: 0.0.40
codegen_flags: <defaults>
</compile_context>

<pallas_src>
import functools

import jax
import jax.numpy as jnp
from jax.experimental import pallas as pl
from jax.experimental.pallas import tpu as pltpu


def _ce_partial_kernel(n_total, tile_rows, cls_ref, labels_ref, out_ref):
    """Per-tile partial cross-entropy sum.

    cls_ref:    (TN, C) logits in the caller's dtype, upcast to f32 in VMEM.
    labels_ref: (TN, 1) int32 class indices (assumed in [0, C); no
                ignore_index support, matching the module's default usage).
    out_ref:    (1, 8, 128) f32 block holding this tile's partial loss sum,
                broadcast across the block (wrapper reads element [0, 0]).
    """
    logits = cls_ref[...].astype(jnp.float32)                    # (TN, C)
    labels = labels_ref[...]                                     # (TN, 1)
    tn, c = logits.shape

    # Valid-row mask for the padded tail tile (rows >= true batch size).
    row_ids = jax.lax.broadcasted_iota(jnp.int32, (tn, 1), 0)    # (TN, 1)
    valid = (row_ids + pl.program_id(0) * tile_rows) < n_total   # (TN, 1)

    # Label pick straight off the RAW logits: this compare/select/sum sweep
    # is independent of the max/sub/exp chain below (better VPU ILP than
    # picking from the shifted logits).
    col_ids = jax.lax.broadcasted_iota(jnp.int32, (tn, c), 1)    # (TN, C)
    picked = jnp.sum(jnp.where(col_ids == labels, logits, 0.0),
                     axis=-1, keepdims=True)                     # (TN, 1)

    # Numerically stable per-row logsumexp.
    row_max = jnp.max(logits, axis=-1, keepdims=True)            # (TN, 1)
    sum_exp = jnp.sum(jnp.exp(logits - row_max),
                      axis=-1, keepdims=True)                    # (TN, 1)

    # loss_i = logsumexp_i - logits[i, labels_i]
    per_example = row_max + jnp.log(sum_exp) - picked            # (TN, 1)

    # Padded tail rows compute on stale VMEM contents; jnp.where (NOT a
    # multiply-by-mask) drops them even if they are NaN/Inf. Keep it a select.
    per_example = jnp.where(valid, per_example, 0.0)

    # Lane-dense, (8,128)-aligned partial-sum block: unmasked stores and one
    # tiny writeback per tile.
    out_ref[...] = jnp.broadcast_to(jnp.sum(per_example), (1, 8, 128))


def _vmem_and_tile_targets():
    """Per-generation VMEM budget and raw-logits-bytes-per-tile target."""
    vmem_cap = 64 * 1024 * 1024   # conservative default (v7x: 64 MiB per TC)
    try:
        info = pltpu.get_tpu_info()
        cap = getattr(info, "vmem_capacity_bytes", None)
        if cap:
            vmem_cap = int(cap)
    except Exception:
        pass
    if vmem_cap >= 128 * 1024 * 1024:        # v5e / v6e: 128 MiB VMEM
        return 96 * 1024 * 1024, 8 * 1024 * 1024
    else:                                    # v7x: 64 MiB per TensorCore
        return 48 * 1024 * 1024, 4 * 1024 * 1024


def _choose_tile_rows(n, c, in_itemsize, vmem_limit_bytes, raw_tile_target_bytes):
    """Pick the row-tile size (multiple of 8), f32-working-set aware."""
    n_pad8 = ((n + 7) // 8) * 8

    # VMEM bytes per row live while a tile is processed:
    #   2 * C * itemsize   double-buffered streamed logits (native dtype)
    # + ~5 * C * 4         f32 temporaries in the body (upcast logits, iota,
    #                      select/pick, shifted, exp) -- conservative bound.
    per_row_vmem = 2 * c * in_itemsize + 5 * c * 4
    tn_vmem = (3 * vmem_limit_bytes // 4) // max(1, per_row_vmem)

    # Cap the raw streamed bytes per tile at the per-generation target; this
    # amortizes the ~0.35 us/grid-step overhead without oversizing the DMA.
    tn_raw = raw_tile_target_bytes // max(1, c * in_itemsize)

    tn = min(tn_vmem, tn_raw, n_pad8)
    tn = max(8, (tn // 8) * 8)

    # Keep >= 4 tiles (>= 2 per TensorCore for the v7x megacore split) when
    # the batch is large enough that tiles stay >= ~1 MiB of raw logits each.
    min_rows = max(8, ((1024 * 1024) // max(1, c * in_itemsize)) // 8 * 8)
    if n_pad8 >= 4 * min_rows:
        tn = min(tn, max(min_rows, (n_pad8 // 4) // 8 * 8))

    return tn


def distinctive_loss_sed(cls_x: jax.Array, labels: jax.Array) -> jax.Array:
    """Mean cross-entropy loss, matching torch.nn.CrossEntropyLoss defaults.

    Labels are assumed to lie in [0, C) (no ignore_index support).
    """
    n, c = cls_x.shape
    vmem_limit, raw_tile_target = _vmem_and_tile_targets()
    tn = _choose_tile_rows(n, c, jnp.dtype(cls_x.dtype).itemsize,
                           vmem_limit, raw_tile_target)
    num_tiles = pl.cdiv(n, tn)

    labels2d = labels.astype(jnp.int32).reshape(n, 1)
    kernel = functools.partial(_ce_partial_kernel, n, tn)

    # TODO(synk): for C < 128 the lane dimension is only C/128 utilized; a
    # wrapper-side fold of k=128//C rows per vreg row with segmented in-kernel
    # reductions would recover the padding (matters only when not HBM-bound).
    partials = pl.pallas_call(
        kernel,
        out_shape=jax.ShapeDtypeStruct((num_tiles, 8, 128), jnp.float32),
        grid_spec=pltpu.PrefetchScalarGridSpec(
            num_scalar_prefetch=0,
            grid=(num_tiles,),
            in_specs=[
                pl.BlockSpec((tn, c), lambda i: (i, 0)),   # logits, native dtype
                pl.BlockSpec((tn, 1), lambda i: (i, 0)),   # labels
            ],
            out_specs=pl.BlockSpec((1, 8, 128), lambda i: (i, 0, 0)),
        ),
        compiler_params=pltpu.CompilerParams(
            dimension_semantics=("parallel",),   # v7x: two TCs split the grid
            vmem_limit_bytes=vmem_limit,
        ),
    )(cls_x, labels2d)

    # Tiny final reduction + mean in plain JAX (num_tiles scalars).
    return jnp.sum(partials[:, 0, 0]) / jnp.float32(n)


if __name__ == "__main__":
    key = jax.random.PRNGKey(0)
    k_logits, k_labels = jax.random.split(key)

    N, C = 8, 32  # small batch of logits over 32 classes
    cls_x = jax.random.normal(k_logits, (N, C), dtype=jnp.float32)
    labels = jax.random.randint(k_labels, (N,), 0, C, dtype=jnp.int32)

    loss = distinctive_loss_sed(cls_x, labels)
    loss = jax.block_until_ready(loss)

    # Reference check against pure-JAX cross entropy (same math as PyTorch).
    lse = jax.scipy.special.logsumexp(cls_x, axis=-1)
    picked = cls_x[jnp.arange(N), labels]
    ref = jnp.mean(lse - picked)
    assert jnp.allclose(loss, ref, atol=1e-5, rtol=1e-5), (loss, ref)

    print("KERNEL_OK")
</pallas_src>

<mosaic_0001>
module attributes {stable_mosaic.version = 11 : i64} {
  func.func @_ce_partial_kernel(%arg0: i32, %arg1: memref<8x32xf32, #tpu.memory_space<vmem>>, %arg2: memref<8x1xi32, #tpu.memory_space<vmem>>, %arg3: memref<1x8x128xf32, #tpu.memory_space<vmem>>) attributes {dimension_semantics = [#tpu.dimension_semantics<parallel>], iteration_bounds = array<i64: 1>, scalar_prefetch = 0 : i64, scratch_operands = 0 : i64, tpu.core_type = #tpu.core_type<tc>, window_params = [{transform_indices = @transform_0, window_bounds = array<i64: 8, 32>}, {transform_indices = @transform_1, window_bounds = array<i64: 8, 1>}, {transform_indices = @transform_2, window_bounds = array<i64: 1, 8, 128>}]} {
    %c0 = arith.constant 0 : index
    %c0_0 = arith.constant 0 : index
    %0 = vector.load %arg1[%c0, %c0_0] : memref<8x32xf32, #tpu.memory_space<vmem>>, vector<8x32xf32>
    %c0_1 = arith.constant 0 : index
    %c0_2 = arith.constant 0 : index
    %1 = vector.load %arg2[%c0_1, %c0_2] : memref<8x1xi32, #tpu.memory_space<vmem>>, vector<8x1xi32>
    %2 = tpu.iota {dimensions = array<i32: 0>} : vector<8x1xi32>
    %c8_i32 = arith.constant 8 : i32
    %3 = arith.muli %arg0, %c8_i32 : i32
    %4 = vector.broadcast %3 : i32 to vector<8x1xi32>
    %5 = arith.addi %2, %4 : vector<8x1xi32>
    %c8_i32_3 = arith.constant 8 : i32
    %6 = vector.broadcast %c8_i32_3 : i32 to vector<8x1xi32>
    %7 = arith.cmpi slt, %5, %6 : vector<8x1xi32>
    %8 = tpu.iota {dimensions = array<i32: 1>} : vector<8x32xi32>
    %9 = vector.broadcast %1 : vector<8x1xi32> to vector<8x32xi32>
    %10 = arith.cmpi eq, %8, %9 : vector<8x32xi32>
    %cst = arith.constant 0.000000e+00 : f32
    %11 = vector.broadcast %cst : f32 to vector<8x32xf32>
    %12 = arith.select %10, %0, %11 : vector<8x32xi1>, vector<8x32xf32>
    %cst_4 = arith.constant dense<0.000000e+00> : vector<8xf32>
    %13 = vector.multi_reduction <add>, %12, %cst_4 [1] : vector<8x32xf32> to vector<8xf32>
    %14 = vector.shape_cast %13 : vector<8xf32> to vector<8x1xf32>
    %cst_5 = arith.constant dense<0xFF800000> : vector<8xf32>
    %15 = vector.multi_reduction <maximumf>, %0, %cst_5 [1] : vector<8x32xf32> to vector<8xf32>
    %16 = vector.shape_cast %15 : vector<8xf32> to vector<8x1xf32>
    %17 = vector.broadcast %16 : vector<8x1xf32> to vector<8x32xf32>
    %18 = arith.subf %0, %17 : vector<8x32xf32>
    %19 = math.exp %18 : vector<8x32xf32>
    %cst_6 = arith.constant dense<0.000000e+00> : vector<8xf32>
    %20 = vector.multi_reduction <add>, %19, %cst_6 [1] : vector<8x32xf32> to vector<8xf32>
    %21 = vector.shape_cast %20 : vector<8xf32> to vector<8x1xf32>
    %22 = math.log %21 : vector<8x1xf32>
    %23 = arith.addf %16, %22 : vector<8x1xf32>
    %24 = arith.subf %23, %14 : vector<8x1xf32>
    %cst_7 = arith.constant 0.000000e+00 : f32
    %25 = vector.broadcast %cst_7 : f32 to vector<8x1xf32>
    %26 = arith.select %7, %24, %25 : vector<8x1xi1>, vector<8x1xf32>
    %27 = vector.shape_cast %26 : vector<8x1xf32> to vector<1x8x1xf32>
    %cst_8 = arith.constant dense<0.000000e+00> : vector<1xf32>
    %28 = vector.multi_reduction <add>, %27, %cst_8 [1, 2] : vector<1x8x1xf32> to vector<1xf32>
    %29 = vector.shape_cast %28 : vector<1xf32> to vector<1x1x1xf32>
    %30 = vector.extract %29[0, 0, 0] : f32 from vector<1x1x1xf32>
    %31 = vector.broadcast %30 : f32 to vector<1x8x128xf32>
    %c0_9 = arith.constant 0 : index
    %c0_10 = arith.constant 0 : index
    %c0_11 = arith.constant 0 : index
    %32 = vector.load %arg3[%c0_9, %c0_10, %c0_11] : memref<1x8x128xf32, #tpu.memory_space<vmem>>, vector<1x8x128xf32>
    tpu.vector_store %arg3[%c0_9, %c0_10, %c0_11], %31 {strides = array<i32>} : memref<1x8x128xf32, #tpu.memory_space<vmem>>, vector<1x8x128xf32>,
    return
  }
  func.func @transform_0(%arg0: i32) -> (i32, i32) {
    %c0_i32 = arith.constant 0 : i32
    %c0_i32_0 = arith.constant 0 : i32
    return %arg0, %c0_i32 : i32, i32
  }
  func.func @transform_1(%arg0: i32) -> (i32, i32) {
    %c0_i32 = arith.constant 0 : i32
    %c0_i32_0 = arith.constant 0 : i32
    return %arg0, %c0_i32 : i32, i32
  }
  func.func @transform_2(%arg0: i32) -> (i32, i32, i32) {
    %c0_i32 = arith.constant 0 : i32
    %c0_i32_0 = arith.constant 0 : i32
    %c0_i32_1 = arith.constant 0 : i32
    return %arg0, %c0_i32, %c0_i32_0 : i32, i32, i32
  }
}

</mosaic_0001>

<bundles_post_ra>
// kernel: tpu_custom_call.1
= control target key start
LH: loop header
LB: loop body
LE: loop exit
PB: predicated region body
PF: predicated region fallthrough
CT: control target
= control target key end

     0   :  { %vm27_vm0 = vcmask 261120   ;;  %s138_s0 = inlined_call_operand.vmem [shape: f32[8,32], index: 0, kind: input, shape index: {}]   ;;  %s139_s1 = inlined_call_operand.vmem [shape: s32[8,1], index: 1, kind: input, shape index: {}]   ;;  %s140_s2 = inlined_call_operand.hbm [shape: f32[1,8,128], index: 2, kind: output, shape index: {}]  }
   0x1   :  { %v12_v0 = vld [vmem:[%s138_s0] sm:$0xff] }
   0x2   :  { %7 = vsyncpa [#allocation3], 0  ;;  %v31_v1 = vsel %vm27_vm0, %v12_v0, -inf  ;;  %v109_v2 = vmov 0   ;;  %v13_v3 = vld [vmem:[%s139_s1] sm:$0xff]  ;;  %v20_v9 = vlaneseq  ;;  %vm45_vm2 = vcmask 7168  }
   0x3   :  { %78 = vset.pattern.permute.xlu0 %v109_v2  ;;  %s110_s0 = smov [#allocation2]   ;;  %s65_s15 = sshll.u32 %s140_s2, 4  ;;  %s66_s15 = int_to_ptr.hbm [resolvable:$true] %s65_s15 }
   0x4   :  { %32 = vmax.xlane.f32.xlu0 %v31_v1  ;;  %v21_v10 = vand.u32 127, %v20_v9  ;;  %s63_s1 = sshll.u32 %s110_s0, 4  ;;  %s64_s1 = int_to_ptr.vmem [resolvable:$true] %s63_s1 }
  0x18   :  { %23 = vperm.xlu0 %78, %v13_v3  }
  0x77   :  { %v33_v4 = vpop.xlane.xlu0 %32 }
  0x78   :  { %v34_v5 = vsub.f32 %v12_v0, %v33_v4 }
  0x7a   :  { %v35_v6 = vmul.f32 1.442695, %v34_v5 }
  0x7c   :  { %79 = vpow2.f32 %v35_v6 }
  0x82   :  { %v80_v7 = vpop.eup %79 }
  0x83   :  { %v37_v8 = vsel %vm27_vm0, %v80_v7, 0.0 }
  0x84   :  { %38 = vadd.xlane.f32.xlu1 %v37_v8 }
  0x8a   :  { %v24_v11 = vpop.permute.xlu0 %23 }
  0x8b   :  { %vm25_vm1 = vcmp.eq.s32.totalorder %v21_v10, %v24_v11 }
  0x8c   :  { %v26_v12 = vsel %vm25_vm1, %v12_v0, 0.0 }
  0x8d   :  { %v28_v13 = vsel %vm27_vm0, %v26_v12, 0.0 }
  0x8e   :  { %29 = vadd.xlane.f32.xlu1 %v28_v13 }
  0xf7   :  { %v39_v14 = vpop.xlane.xlu1 %38 }
  0xf8   :  { %81 = vlog2.f32 %v39_v14 }
  0xfe   :  { %v82_v15 = vpop.eup %81 }
  0xff   :  { %v41_v16 = vmul.f32 0.6931472, %v82_v15 }
 0x101   :  { %v42_v17 = vadd.f32 %v41_v16, %v33_v4  ;;  %v30_v18 = vpop.xlane.xlu1 %29 }
 0x103   :  { %v43_v19 = vsub.f32 %v42_v17, %v30_v18 }
 0x105   :  { %v46_v20 = vsel %vm45_vm2, %v43_v19, 0.0 }
 0x106   :  { %47 = vadd.xlane.f32.xlu2 %v46_v20 }
 0x179   :  { %v48_v21 = vpop.xlane.xlu2 %47 }
 0x17a   :  { %v49_v22 = vrot.slane %v48_v21, 4 }
 0x17c   :  { %v50_v23 = vadd.f32 %v49_v22, %v48_v21 }
 0x17e   :  { %v51_v24 = vrot.slane %v50_v23, 2 }
 0x180   :  { %v52_v25 = vadd.f32 %v51_v24, %v50_v23 }
 0x182   :  { %v53_v26 = vrot.slane %v52_v25, 1 }
 0x184   :  { %v54_v27 = vadd.f32 %v53_v26, %v52_v25 }
 0x186   :  { %74 = vpush %v54_v27 }
 0x1b7   :  { %s75_s16 = spop %74 }
 0x1b8   :  { %v56_v28 = vstv %s75_s16 }
 0x1b9   :  { %57 = vst [vmem:[#allocation2] sm:$0xff] %v56_v28 }
 0x1ba   :  { %68 = dma.vmem_to_hbm [thread:$0]  %s64_s1, 128, %s66_s15, [#allocation3]  }
 0x1bb   :  { %107 = dma.done.wait [#allocation3], 128  }
 0x1bc   :  { %108 = vsyncadd [#allocation3], 4294967168 }
 0x1bd   :  { %73 = vsyncpa [#allocation3], 1 }

</bundles_post_ra>
